<compile_context>
chip_gen: v5e
topology: v5e:2x2
jax: 0.10.0
libtpu: 0.0.40
codegen_flags: <defaults>
</compile_context>

<pallas_src>
import math

import numpy as np
import jax
import jax.numpy as jnp
from jax.experimental import pallas as pl
from jax.experimental.pallas import tpu as pltpu


def _round_up(a, m):
    return ((a + m - 1) // m) * m


# ----------------------------------------------------------------------------
# Pallas kernel: whole 5-layer network for one batch tile of tb samples,
# computed with the batch on the lane axis (all intermediates (C, tb)).
# ----------------------------------------------------------------------------
def mctd_kernel(x_ref, w1_ref, b1_ref, w2_ref, b2_ref, w3_ref, b3_ref,
                w4_ref, b4_ref, w5_ref, b5_ref, o_ref):
    # x tile: (tb, 128) -> bf16 for the MXU (board values are {0,1}: exact).
    x = x_ref[...].astype(jnp.bfloat16)

    # c1: Conv1d(4, 32, 12, stride=4), all 6 output positions fused.
    # NT contraction: (192, 128) . (tb, 128)^T -> (192, tb), f32 accumulate.
    h1 = jax.lax.dot_general(
        w1_ref[...], x, (((1,), (1,)), ((), ())),
        preferred_element_type=jnp.float32)
    h1 = jnp.maximum(h1 + b1_ref[...], 0.0)                     # (192, tb)

    # c2: Conv1d(32, 16, 1, groups=4) -> block-diagonal dense matmul.
    h2 = jnp.dot(w2_ref[...], h1.astype(jnp.bfloat16),
                 preferred_element_type=jnp.float32)
    h2 = jnp.maximum(h2 + b2_ref[...], 0.0)                     # (96, tb)

    # c3: Conv1d(16, 16, 3, stride=2, groups=4) -> block matmul (2 positions).
    h3 = jnp.dot(w3_ref[...], h2.astype(jnp.bfloat16),
                 preferred_element_type=jnp.float32)
    h3 = jnp.maximum(h3 + b3_ref[...], 0.0)                     # (32, tb)

    # c4: Conv1d(16, 8, 2) -> single matmul over both taps.
    h4 = jnp.dot(w4_ref[...], h3.astype(jnp.bfloat16),
                 preferred_element_type=jnp.float32)
    h4 = jnp.maximum(h4 + b4_ref[...], 0.0)                     # (8, tb)

    # c5: Conv1d(8, 1, 1) + sigmoid, off the MXU: VPU mul + sublane reduce.
    logit = jnp.sum(h4 * w5_ref[...], axis=0, keepdims=True) + b5_ref[...]
    o_ref[...] = jax.nn.sigmoid(logit)                          # (1, tb) lane-dense


# ----------------------------------------------------------------------------
# One-time weight packing (pure numpy -> device bf16/f32 arrays).
# ----------------------------------------------------------------------------
def pack_mctd_params(params):
    """Pack PyTorch-layout conv weights into the fused, batch-on-lanes
    block-matmul layout used by the kernel. Call once; reuse the result."""
    w1, b1, w2, b2, w3, b3, w4, b4, w5, b5 = [
        np.asarray(p, np.float32) for p in params]

    # c1: rows j = 32*t + o (position t, out-ch o); cols f = 32*c + l
    # (matching the zero-copy channel-major flatten of the (N, 4, 32) input).
    W1 = np.zeros((192, 128), np.float32)
    for t in range(6):
        for o in range(32):
            for c in range(4):
                for k in range(12):
                    W1[32 * t + o, 32 * c + 4 * t + k] = w1[o, c, k]

    # c2 (groups=4, kernel 1): rows 16*t + o ; cols 32*t + (8*g + ci).
    W2 = np.zeros((96, 192), np.float32)
    for t in range(6):
        for o in range(16):
            g = o // 4
            for ci in range(8):
                W2[16 * t + o, 32 * t + 8 * g + ci] = w2[o, ci, 0]

    # c3 (groups=4, kernel 3, stride 2): rows 16*t + o ; cols 16*(2t+k) + (4g+ci).
    W3 = np.zeros((32, 96), np.float32)
    for t in range(2):
        for o in range(16):
            g = o // 4
            for k in range(3):
                for ci in range(4):
                    W3[16 * t + o, 16 * (2 * t + k) + 4 * g + ci] = w3[o, ci, k]

    # c4 (kernel 2): rows o ; cols 16*k + ci.
    W4 = np.zeros((8, 32), np.float32)
    for o in range(8):
        for k in range(2):
            for ci in range(16):
                W4[o, 16 * k + ci] = w4[o, ci, k]

    # c5: column vector used on the VPU.
    W5 = w5[0, :, 0].reshape(8, 1)

    B1 = np.tile(b1, 6).reshape(192, 1)
    B2 = np.tile(b2, 6).reshape(96, 1)
    B3 = np.tile(b3, 2).reshape(32, 1)
    B4 = b4.reshape(8, 1)
    B5 = b5.reshape(1, 1)

    bf16 = lambda a: jnp.asarray(a, jnp.bfloat16)
    f32 = lambda a: jnp.asarray(a, jnp.float32)
    return (bf16(W1), f32(B1), bf16(W2), f32(B2), bf16(W3), f32(B3),
            bf16(W4), f32(B4), f32(W5), f32(B5))


# ----------------------------------------------------------------------------
# Forward wrapper.
# ----------------------------------------------------------------------------
def mctd_forward(x_ncl, packed, tb=None):
    """x_ncl: (N, 4, 32) board planes (bf16 preferred; f32 accepted — the cast
    to bf16 happens inside the kernel).  Returns (N, 1, 1) float32."""
    W1, B1, W2, B2, W3, B3, W4, B4, W5, B5 = packed
    N = x_ncl.shape[0]

    # Zero-copy lane-dense flatten: (N, 4, 32) -> (N, 128), f = 32*c + l.
    x_flat = jnp.reshape(x_ncl, (N, 128))
    if x_flat.dtype != jnp.bfloat16 and x_flat.dtype != jnp.float32:
        x_flat = x_flat.astype(jnp.bfloat16)

    # Pad the batch only to bf16 sublane granularity (16) when needed — never
    # to a multiple of tb (that would be a full extra HBM pass over x).
    rows = _round_up(N, 16)
    if rows != N:
        x_flat = jnp.pad(x_flat, ((0, rows - N), (0, 0)))

    if tb is None:
        # Aim for >=4 grid steps at large N (keeps both v7x TensorCores busy
        # via the "parallel" grid axis); clamp the tile to [256, 2048].
        tb = max(256, min(2048, _round_up(pl.cdiv(N, 4), 128)))
    tb = _round_up(max(int(tb), 16), 16)
    tb = min(tb, rows)
    n_tiles = pl.cdiv(rows, tb)

    def _const(shape):
        nd = len(shape)
        return pl.BlockSpec(shape, lambda i, _nd=nd: (0,) * _nd)

    out = pl.pallas_call(
        mctd_kernel,
        out_shape=jax.ShapeDtypeStruct((n_tiles, 1, tb), jnp.float32),
        grid=(n_tiles,),
        in_specs=[
            pl.BlockSpec((tb, 128), lambda i: (i, 0)),
            _const(W1.shape), _const(B1.shape),
            _const(W2.shape), _const(B2.shape),
            _const(W3.shape), _const(B3.shape),
            _const(W4.shape), _const(B4.shape),
            _const(W5.shape), _const(B5.shape),
        ],
        out_specs=pl.BlockSpec((None, 1, tb), lambda i: (i, 0, 0)),
        compiler_params=pltpu.CompilerParams(
            dimension_semantics=("parallel",),
            vmem_limit_bytes=48 * 1024 * 1024),
    )(x_flat, W1, B1, W2, B2, W3, B3, W4, B4, W5, B5)

    # (n_tiles, 1, tb) row-major == global sample order; drop padded tail.
    return out.reshape(-1)[:N].reshape(N, 1, 1)


# ----------------------------------------------------------------------------
# Pure-JAX reference (lax convs) for validation.
# ----------------------------------------------------------------------------
def ref_forward(x, params):
    w1, b1, w2, b2, w3, b3, w4, b4, w5, b5 = params

    def conv(h, w, b, stride, groups):
        y = jax.lax.conv_general_dilated(
            h, w, window_strides=(stride,), padding='VALID',
            dimension_numbers=('NCH', 'OIH', 'NCH'),
            feature_group_count=groups)
        return y + b[None, :, None]

    h = jax.nn.relu(conv(x, w1, b1, 4, 1))
    h = jax.nn.relu(conv(h, w2, b2, 1, 4))
    h = jax.nn.relu(conv(h, w3, b3, 2, 4))
    h = jax.nn.relu(conv(h, w4, b4, 1, 1))
    return jax.nn.sigmoid(conv(h, w5, b5, 1, 1))


# ----------------------------------------------------------------------------
def init_conv(key, c_out, c_in_per_group, k):
    """Deterministic PyTorch-style uniform init, bound = 1/sqrt(fan_in)."""
    fan_in = c_in_per_group * k
    bound = 1.0 / math.sqrt(fan_in)
    kw, kb = jax.random.split(key)
    w = jax.random.uniform(kw, (c_out, c_in_per_group, k), jnp.float32,
                           -bound, bound)
    b = jax.random.uniform(kb, (c_out,), jnp.float32, -bound, bound)
    return w, b


if __name__ == "__main__":
    key = jax.random.PRNGKey(0)
    keys = jax.random.split(key, 6)

    w1, b1 = init_conv(keys[0], 32, 4, 12)   # Conv1d(4, 32, 12, stride=4)
    w2, b2 = init_conv(keys[1], 16, 8, 1)    # Conv1d(32, 16, 1, groups=4)
    w3, b3 = init_conv(keys[2], 16, 4, 3)    # Conv1d(16, 16, 3, groups=4, s=2)
    w4, b4 = init_conv(keys[3], 8, 16, 2)    # Conv1d(16, 8, 2)
    w5, b5 = init_conv(keys[4], 1, 8, 1)     # Conv1d(8, 1, 1)
    params = (w1, b1, w2, b2, w3, b3, w4, b4, w5, b5)

    packed = pack_mctd_params(params)        # one-time, numpy-side packing

    # Board-like binary input, (batch=19, channels=4, length=32) NCL layout.
    # Built directly as bf16 (values are {0,1}, so exact) to keep the kernel's
    # HBM input read at 2 bytes/feature.
    x_bits = jax.random.uniform(keys[5], (19, 4, 32)) < 0.3
    x = x_bits.astype(jnp.bfloat16)

    y_ref = ref_forward(x_bits.astype(jnp.float32), params)

    # Default path (single tile at this small batch).
    y = jax.block_until_ready(mctd_forward(x, packed))
    assert y.shape == (19, 1, 1)
    np.testing.assert_allclose(np.asarray(y), np.asarray(y_ref),
                               atol=2e-2, rtol=2e-2)

    # Small explicit tile: exercises the multi-step grid + batch-padding path.
    y2 = jax.block_until_ready(mctd_forward(x, packed, tb=16))
    np.testing.assert_allclose(np.asarray(y2), np.asarray(y_ref),
                               atol=2e-2, rtol=2e-2)

    print("KERNEL_OK")
</pallas_src>

<mosaic_0001>
module attributes {stable_mosaic.version = 11 : i64} {
  func.func @mctd_kernel(%arg0: i32, %arg1: memref<32x128xbf16, #tpu.memory_space<vmem>>, %arg2: memref<192x128xbf16, #tpu.memory_space<vmem>>, %arg3: memref<192x1xf32, #tpu.memory_space<vmem>>, %arg4: memref<96x192xbf16, #tpu.memory_space<vmem>>, %arg5: memref<96x1xf32, #tpu.memory_space<vmem>>, %arg6: memref<32x96xbf16, #tpu.memory_space<vmem>>, %arg7: memref<32x1xf32, #tpu.memory_space<vmem>>, %arg8: memref<8x32xbf16, #tpu.memory_space<vmem>>, %arg9: memref<8x1xf32, #tpu.memory_space<vmem>>, %arg10: memref<8x1xf32, #tpu.memory_space<vmem>>, %arg11: memref<1x1xf32, #tpu.memory_space<vmem>>, %arg12: memref<1x1x32xf32, #tpu.memory_space<vmem>>) attributes {dimension_semantics = [#tpu.dimension_semantics<parallel>], iteration_bounds = array<i64: 1>, scalar_prefetch = 0 : i64, scratch_operands = 0 : i64, tpu.core_type = #tpu.core_type<tc>, window_params = [{transform_indices = @transform_0, window_bounds = array<i64: 32, 128>}, {pipeline_mode = #tpu.pipeline_mode<synchronous>, transform_indices = @transform_1, window_bounds = array<i64: 192, 128>}, {pipeline_mode = #tpu.pipeline_mode<synchronous>, transform_indices = @transform_2, window_bounds = array<i64: 192, 1>}, {pipeline_mode = #tpu.pipeline_mode<synchronous>, transform_indices = @transform_3, window_bounds = array<i64: 96, 192>}, {pipeline_mode = #tpu.pipeline_mode<synchronous>, transform_indices = @transform_4, window_bounds = array<i64: 96, 1>}, {pipeline_mode = #tpu.pipeline_mode<synchronous>, transform_indices = @transform_5, window_bounds = array<i64: 32, 96>}, {pipeline_mode = #tpu.pipeline_mode<synchronous>, transform_indices = @transform_6, window_bounds = array<i64: 32, 1>}, {pipeline_mode = #tpu.pipeline_mode<synchronous>, transform_indices = @transform_7, window_bounds = array<i64: 8, 32>}, {pipeline_mode = #tpu.pipeline_mode<synchronous>, transform_indices = @transform_8, window_bounds = array<i64: 8, 1>}, {pipeline_mode = #tpu.pipeline_mode<synchronous>, transform_indices = @transform_9, window_bounds = array<i64: 8, 1>}, {pipeline_mode = #tpu.pipeline_mode<synchronous>, transform_indices = @transform_10, window_bounds = array<i64: 1, 1>}, {transform_indices = @transform_11, window_bounds = array<i64: 1, 1, 32>}]} {
    %c0 = arith.constant 0 : index
    %c0_0 = arith.constant 0 : index
    %0 = vector.load %arg1[%c0, %c0_0] : memref<32x128xbf16, #tpu.memory_space<vmem>>, vector<32x128xbf16>
    %c0_1 = arith.constant 0 : index
    %c0_2 = arith.constant 0 : index
    %1 = vector.load %arg2[%c0_1, %c0_2] : memref<192x128xbf16, #tpu.memory_space<vmem>>, vector<192x128xbf16>
    %cst = arith.constant dense<0.000000e+00> : vector<192x32xf32>
    %2 = tpu.matmul %1, %0, %cst {dimension_numbers = #tpu.dot_dimension_numbers<[1], [1], [0], [0], [0, 0, 1, 0], [], []>} : vector<192x128xbf16>, vector<32x128xbf16>, vector<192x32xf32> -> vector<192x32xf32>
    %c0_3 = arith.constant 0 : index
    %c0_4 = arith.constant 0 : index
    %3 = vector.load %arg3[%c0_3, %c0_4] : memref<192x1xf32, #tpu.memory_space<vmem>>, vector<192x1xf32>
    %4 = vector.broadcast %3 : vector<192x1xf32> to vector<192x32xf32>
    %5 = arith.addf %2, %4 : vector<192x32xf32>
    %cst_5 = arith.constant 0.000000e+00 : f32
    %6 = vector.broadcast %cst_5 : f32 to vector<192x32xf32>
    %7 = arith.maximumf %5, %6 : vector<192x32xf32>
    %c0_6 = arith.constant 0 : index
    %c0_7 = arith.constant 0 : index
    %8 = vector.load %arg4[%c0_6, %c0_7] : memref<96x192xbf16, #tpu.memory_space<vmem>>, vector<96x192xbf16>
    %9 = arith.truncf %7 : vector<192x32xf32> to vector<192x32xbf16>
    %cst_8 = arith.constant dense<0.000000e+00> : vector<96x32xf32>
    %10 = tpu.matmul %8, %9, %cst_8 {dimension_numbers = #tpu.dot_dimension_numbers<[1], [0], [0], [1], [0, 0, 1, 1], [], []>} : vector<96x192xbf16>, vector<192x32xbf16>, vector<96x32xf32> -> vector<96x32xf32>
    %c0_9 = arith.constant 0 : index
    %c0_10 = arith.constant 0 : index
    %11 = vector.load %arg5[%c0_9, %c0_10] : memref<96x1xf32, #tpu.memory_space<vmem>>, vector<96x1xf32>
    %12 = vector.broadcast %11 : vector<96x1xf32> to vector<96x32xf32>
    %13 = arith.addf %10, %12 : vector<96x32xf32>
    %cst_11 = arith.constant 0.000000e+00 : f32
    %14 = vector.broadcast %cst_11 : f32 to vector<96x32xf32>
    %15 = arith.maximumf %13, %14 : vector<96x32xf32>
    %c0_12 = arith.constant 0 : index
    %c0_13 = arith.constant 0 : index
    %16 = vector.load %arg6[%c0_12, %c0_13] : memref<32x96xbf16, #tpu.memory_space<vmem>>, vector<32x96xbf16>
    %17 = arith.truncf %15 : vector<96x32xf32> to vector<96x32xbf16>
    %cst_14 = arith.constant dense<0.000000e+00> : vector<32x32xf32>
    %18 = tpu.matmul %16, %17, %cst_14 {dimension_numbers = #tpu.dot_dimension_numbers<[1], [0], [0], [1], [0, 0, 1, 1], [], []>} : vector<32x96xbf16>, vector<96x32xbf16>, vector<32x32xf32> -> vector<32x32xf32>
    %c0_15 = arith.constant 0 : index
    %c0_16 = arith.constant 0 : index
    %19 = vector.load %arg7[%c0_15, %c0_16] : memref<32x1xf32, #tpu.memory_space<vmem>>, vector<32x1xf32>
    %20 = vector.broadcast %19 : vector<32x1xf32> to vector<32x32xf32>
    %21 = arith.addf %18, %20 : vector<32x32xf32>
    %cst_17 = arith.constant 0.000000e+00 : f32
    %22 = vector.broadcast %cst_17 : f32 to vector<32x32xf32>
    %23 = arith.maximumf %21, %22 : vector<32x32xf32>
    %c0_18 = arith.constant 0 : index
    %c0_19 = arith.constant 0 : index
    %24 = vector.load %arg8[%c0_18, %c0_19] : memref<8x32xbf16, #tpu.memory_space<vmem>>, vector<8x32xbf16>
    %25 = arith.truncf %23 : vector<32x32xf32> to vector<32x32xbf16>
    %cst_20 = arith.constant dense<0.000000e+00> : vector<8x32xf32>
    %26 = tpu.matmul %24, %25, %cst_20 {dimension_numbers = #tpu.dot_dimension_numbers<[1], [0], [0], [1], [0, 0, 1, 1], [], []>} : vector<8x32xbf16>, vector<32x32xbf16>, vector<8x32xf32> -> vector<8x32xf32>
    %c0_21 = arith.constant 0 : index
    %c0_22 = arith.constant 0 : index
    %27 = vector.load %arg9[%c0_21, %c0_22] : memref<8x1xf32, #tpu.memory_space<vmem>>, vector<8x1xf32>
    %28 = vector.broadcast %27 : vector<8x1xf32> to vector<8x32xf32>
    %29 = arith.addf %26, %28 : vector<8x32xf32>
    %cst_23 = arith.constant 0.000000e+00 : f32
    %30 = vector.broadcast %cst_23 : f32 to vector<8x32xf32>
    %31 = arith.maximumf %29, %30 : vector<8x32xf32>
    %c0_24 = arith.constant 0 : index
    %c0_25 = arith.constant 0 : index
    %32 = vector.load %arg10[%c0_24, %c0_25] : memref<8x1xf32, #tpu.memory_space<vmem>>, vector<8x1xf32>
    %33 = vector.broadcast %32 : vector<8x1xf32> to vector<8x32xf32>
    %34 = arith.mulf %31, %33 : vector<8x32xf32>
    %cst_26 = arith.constant dense<0.000000e+00> : vector<32xf32>
    %35 = vector.multi_reduction <add>, %34, %cst_26 [0] : vector<8x32xf32> to vector<32xf32>
    %36 = vector.shape_cast %35 : vector<32xf32> to vector<1x32xf32>
    %c0_27 = arith.constant 0 : index
    %c0_28 = arith.constant 0 : index
    %37 = vector.load %arg11[%c0_27, %c0_28] : memref<1x1xf32, #tpu.memory_space<vmem>>, vector<1x1xf32>
    %38 = vector.broadcast %37 : vector<1x1xf32> to vector<1x32xf32>
    %39 = arith.addf %36, %38 : vector<1x32xf32>
    %40 = arith.negf %39 : vector<1x32xf32>
    %41 = math.exp %40 : vector<1x32xf32>
    %cst_29 = arith.constant 1.000000e+00 : f32
    %42 = vector.broadcast %cst_29 : f32 to vector<1x32xf32>
    %43 = arith.addf %42, %41 : vector<1x32xf32>
    %44 = arith.divf %42, %43 : vector<1x32xf32>
    %c0_30 = arith.constant 0 : index
    %c0_31 = arith.constant 0 : index
    %c0_32 = arith.constant 0 : index
    %45 = vector.load %arg12[%c0_30, %c0_31, %c0_32] : memref<1x1x32xf32, #tpu.memory_space<vmem>>, vector<1x1x32xf32>
    %46 = vector.shape_cast %45 : vector<1x1x32xf32> to vector<1x32xf32>
    %47 = vector.shape_cast %44 : vector<1x32xf32> to vector<1x1x32xf32>
    tpu.vector_store %arg12[%c0_30, %c0_31, %c0_32], %47 {strides = array<i32>} : memref<1x1x32xf32, #tpu.memory_space<vmem>>, vector<1x1x32xf32>,
    return
  }
  func.func @transform_0(%arg0: i32) -> (i32, i32) {
    %c0_i32 = arith.constant 0 : i32
    %c0_i32_0 = arith.constant 0 : i32
    return %arg0, %c0_i32 : i32, i32
  }
  func.func @transform_1(%arg0: i32) -> (i32, i32) {
    %c0_i32 = arith.constant 0 : i32
    %c0_i32_0 = arith.constant 0 : i32
    %c0_i32_1 = arith.constant 0 : i32
    return %c0_i32, %c0_i32_0 : i32, i32
  }
  func.func @transform_2(%arg0: i32) -> (i32, i32) {
    %c0_i32 = arith.constant 0 : i32
    %c0_i32_0 = arith.constant 0 : i32
    %c0_i32_1 = arith.constant 0 : i32
    return %c0_i32, %c0_i32_0 : i32, i32
  }
  func.func @transform_3(%arg0: i32) -> (i32, i32) {
    %c0_i32 = arith.constant 0 : i32
    %c0_i32_0 = arith.constant 0 : i32
    %c0_i32_1 = arith.constant 0 : i32
    return %c0_i32, %c0_i32_0 : i32, i32
  }
  func.func @transform_4(%arg0: i32) -> (i32, i32) {
    %c0_i32 = arith.constant 0 : i32
    %c0_i32_0 = arith.constant 0 : i32
    %c0_i32_1 = arith.constant 0 : i32
    return %c0_i32, %c0_i32_0 : i32, i32
  }
  func.func @transform_5(%arg0: i32) -> (i32, i32) {
    %c0_i32 = arith.constant 0 : i32
    %c0_i32_0 = arith.constant 0 : i32
    %c0_i32_1 = arith.constant 0 : i32
    return %c0_i32, %c0_i32_0 : i32, i32
  }
  func.func @transform_6(%arg0: i32) -> (i32, i32) {
    %c0_i32 = arith.constant 0 : i32
    %c0_i32_0 = arith.constant 0 : i32
    %c0_i32_1 = arith.constant 0 : i32
    return %c0_i32, %c0_i32_0 : i32, i32
  }
  func.func @transform_7(%arg0: i32) -> (i32, i32) {
    %c0_i32 = arith.constant 0 : i32
    %c0_i32_0 = arith.constant 0 : i32
    %c0_i32_1 = arith.constant 0 : i32
    return %c0_i32, %c0_i32_0 : i32, i32
  }
  func.func @transform_8(%arg0: i32) -> (i32, i32) {
    %c0_i32 = arith.constant 0 : i32
    %c0_i32_0 = arith.constant 0 : i32
    %c0_i32_1 = arith.constant 0 : i32
    return %c0_i32, %c0_i32_0 : i32, i32
  }
  func.func @transform_9(%arg0: i32) -> (i32, i32) {
    %c0_i32 = arith.constant 0 : i32
    %c0_i32_0 = arith.constant 0 : i32
    %c0_i32_1 = arith.constant 0 : i32
    return %c0_i32, %c0_i32_0 : i32, i32
  }
  func.func @transform_10(%arg0: i32) -> (i32, i32) {
    %c0_i32 = arith.constant 0 : i32
    %c0_i32_0 = arith.constant 0 : i32
    %c0_i32_1 = arith.constant 0 : i32
    return %c0_i32, %c0_i32_0 : i32, i32
  }
  func.func @transform_11(%arg0: i32) -> (i32, i32, i32) {
    %c0_i32 = arith.constant 0 : i32
    %c0_i32_0 = arith.constant 0 : i32
    %c0_i32_1 = arith.constant 0 : i32
    return %arg0, %c0_i32, %c0_i32_0 : i32, i32, i32
  }
}

</mosaic_0001>

<bundles_post_ra>
// kernel: tpu_custom_call.1
= control target key start
LH: loop header
LB: loop body
LE: loop exit
PB: predicated region body
PF: predicated region fallthrough
CT: control target
= control target key end

     0   :  { %s1358_s0 = inlined_call_operand.vmem [shape: bf16[32,128], index: 0, kind: input, shape index: {}]   ;;  %s1359_s1 = inlined_call_operand.vmem [shape: bf16[192,128], index: 1, kind: input, shape index: {}]   ;;  %s1360_s2 = inlined_call_operand.vmem [shape: f32[192,1], index: 2, kind: input, shape index: {}]   ;;  %s1361_s3 = inlined_call_operand.vmem [shape: bf16[96,192], index: 3, kind: input, shape index: {}]   ;;  %s1362_s4 = inlined_call_operand.vmem [shape: f32[96,1], index: 4, kind: input, shape index: {}]   ;;  %s1363_s5 = inlined_call_operand.vmem [shape: bf16[32,96], index: 5, kind: input, shape index: {}]   ;;  %s1364_s6 = inlined_call_operand.vmem [shape: f32[32,1], index: 6, kind: input, shape index: {}]   ;;  %s1365_s7 = inlined_call_operand.vmem [shape: bf16[8,32], index: 7, kind: input, shape index: {}]   ;;  %s1366_s8 = inlined_call_operand.vmem [shape: f32[8,1], index: 8, kind: input, shape index: {}]   ;;  %s1367_s9 = inlined_call_operand.vmem [shape: f32[8,1], index: 9, kind: input, shape index: {}]   ;;  %s1368_s10 = inlined_call_operand.<no memory space> [shape: f32[1,1], index: 10, kind: input, shape index: {}]   ;;  %s1369_s11 = inlined_call_operand.hbm [shape: f32[1,1,32], index: 11, kind: output, shape index: {}]  }
   0x1   :  { %v16_v0 = vstv %s1368_s10 }
   0x2   :  { %17 = vst [vmem:[#allocation2] sm:$0x1] %v16_v0 }
   0x3   :  { %v84_v1 = vld [vmem:[%s1360_s2 + $0x70] sm:$0xff]  ;;  %v82_v2 = vld [vmem:[%s1360_s2 + $0x60] sm:$0xff]  ;;  %v933_v3 = vld [vmem:[%s1358_s0 + $0x8] sm:$0xff]  ;;  %v999_v4 = vmov 0  }
   0x4   :  { %967 = vset.pattern.permute.xlu1 %v999_v4  ;;  %966 = vset.pattern.permute.xlu0 %v999_v4  ;;  %v80_v5 = vld [vmem:[%s1360_s2 + $0x50] sm:$0xff]  ;;  %v85_v6 = vld [vmem:[%s1360_s2 + $0x78] sm:$0xff]  ;;  %v83_v7 = vld [vmem:[%s1360_s2 + $0x68] sm:$0xff] }
   0x5   :  { %166 = vperm.xlu0 %966, %v84_v1   ;;  %156 = vperm.xlu1 %967, %v82_v2   ;;  %v932_v8 = vld [vmem:[%s1358_s0] sm:$0xff] }
   0x6   :  { %304 = vmatpush.bf16.xpose.msra.mxu0 %v933_v3  ;;  %961 = vmatpush.bf16.xpose.msra.mxu3 %v933_v3 }
   0x7   :  { %968 = vset.pattern.permute.xlu2 %v999_v4  ;;  %960 = vmatpush.bf16.xpose.msra.mxu2 %v933_v3 }
   0x8   :  { %146 = vperm.xlu2 %968, %v80_v5  }
   0x9   :  { %18 = vsyncpa [#allocation4], 0  ;;  %v81_v9 = vld [vmem:[%s1360_s2 + $0x58] sm:$0xff]  ;;  %v79_v10 = vld [vmem:[%s1360_s2 + $0x48] sm:$0xff]  ;;  %vm541_vm0 = vcmask 523264   ;;  %vm694_vm1 = vcmask 785408  }
   0xa   :  { %v78_v11 = vld [vmem:[%s1360_s2 + $0x40] sm:$0xff]  ;;  %v92_v14 = vld [vmem:[%s1360_s2 + $0xb0] sm:$0xff]  ;;  %v93_v15 = vld [vmem:[%s1360_s2 + $0xb8] sm:$0xff]  ;;  %vm733_vm2 = vcmask 261120   ;;  %vm792_vm6 = vcmask 253952  }
   0xb   :  { %v934_v12 = vld [vmem:[%s1359_s1] sm:$0xff]  ;;  %v76_v16 = vld [vmem:[%s1360_s2 + $0x30] sm:$0xff]  ;;  %v77_v17 = vld [vmem:[%s1360_s2 + $0x38] sm:$0xff] }
   0xc   :  { %v942_v13 = vld [vmem:[%s1359_s1 + $0x40] sm:$0xff]  ;;  %v91_v19 = vld [vmem:[%s1360_s2 + $0xa8] sm:$0xff]  ;;  %v941_v23 = vld [vmem:[%s1359_s1 + $0x38] sm:$0xff] }
   0xd   :  { %171 = vperm.xlu0 %966, %v85_v6   ;;  %161 = vperm.xlu1 %967, %v83_v7   ;;  %v90_v18 = vld [vmem:[%s1360_s2 + $0xa0] sm:$0xff]  ;;  %v935_v20 = vld [vmem:[%s1359_s1 + $0x8] sm:$0xff]  ;;  %v88_v24 = vld [vmem:[%s1360_s2 + $0x90] sm:$0xff] }
   0xe   :  { %305 = vmatpush.bf16.xpose.msra.mxu0 %v932_v8  ;;  %963 = vmatpush.bf16.xpose.msra.mxu3 %v932_v8  ;;  %v943_v21 = vld [vmem:[%s1359_s1 + $0x48] sm:$0xff]  ;;  %v74_v22 = vld [vmem:[%s1360_s2 + $0x20] sm:$0xff]  ;;  %v89_v26 = vld [vmem:[%s1360_s2 + $0x98] sm:$0xff] }
   0xf   :  { %962 = vmatpush.bf16.xpose.msra.mxu2 %v932_v8  ;;  %v75_v25 = vld [vmem:[%s1360_s2 + $0x28] sm:$0xff]  ;;  %v73_v27 = vld [vmem:[%s1360_s2 + $0x18] sm:$0xff]  ;;  %v72_v28 = vld [vmem:[%s1360_s2 + $0x10] sm:$0xff] }
  0x10   :  { %151 = vperm.xlu2 %968, %v81_v9   ;;  %v936_v29 = vld [vmem:[%s1359_s1 + $0x10] sm:$0xff]  ;;  %v86_v31 = vld [vmem:[%s1360_s2 + $0x80] sm:$0xff]  ;;  %v87_v32 = vld [vmem:[%s1360_s2 + $0x88] sm:$0xff] }
  0x11   :  { %v944_v30 = vld [vmem:[%s1359_s1 + $0x50] sm:$0xff]  ;;  %v70_v33 = vld [vmem:[%s1360_s2] sm:$0xff]  ;;  %v71_v34 = vld [vmem:[%s1360_s2 + $0x8] sm:$0xff] }
  0x12   :  { %v425_v35 = vld [vmem:[%s1362_s4 + $0x50] sm:$0xff]  ;;  %v426_v36 = vld [vmem:[%s1362_s4 + $0x58] sm:$0xff]  ;;  %v423_v39 = vld [vmem:[%s1362_s4 + $0x40] sm:$0xff] }
  0x13   :  { %v937_v37 = vld [vmem:[%s1359_s1 + $0x18] sm:$0xff]  ;;  %v424_v40 = vld [vmem:[%s1362_s4 + $0x48] sm:$0xff]  ;;  %v421_v41 = vld [vmem:[%s1362_s4 + $0x30] sm:$0xff] }
  0x14   :  { %v945_v38 = vld [vmem:[%s1359_s1 + $0x58] sm:$0xff]  ;;  %v419_v43 = vld [vmem:[%s1362_s4 + $0x20] sm:$0xff]  ;;  %v420_v44 = vld [vmem:[%s1362_s4 + $0x28] sm:$0xff] }
  0x15   :  { %141 = vperm.xlu1 %967, %v79_v10   ;;  %136 = vperm.xlu0 %966, %v78_v11   ;;  %v422_v42 = vld [vmem:[%s1362_s4 + $0x38] sm:$0xff]  ;;  %v938_v45 = vld [vmem:[%s1359_s1 + $0x20] sm:$0xff]  ;;  %v417_v46 = vld [vmem:[%s1362_s4 + $0x10] sm:$0xff] }
  0x16   :  { %306 = vmatmul.bf16.vlgmr.msra.gmra.mxu0 %v934_v12  ;;  %346 = vmatmul.bf16.vlgmr.msra.gmra.mxu3 %v942_v13  ;;  %v418_v47 = vld [vmem:[%s1362_s4 + $0x18] sm:$0xff]  ;;  %v415_v48 = vld [vmem:[%s1362_s4] sm:$0xff]  ;;  %v416_v49 = vld [vmem:[%s1362_s4 + $0x8] sm:$0xff] }
  0x17   :  { %341 = vmatmul.bf16.vlgmr.msra.gmra.mxu2 %v941_v23  ;;  %v662_v50 = vld [vmem:[%s1364_s6 + $0x10] sm:$0xff]  ;;  %v663_v51 = vld [vmem:[%s1364_s6 + $0x18] sm:$0xff]  ;;  %v939_v52 = vld [vmem:[%s1359_s1 + $0x28] sm:$0xff] }
  0x18   :  { %206 = vperm.xlu2 %968, %v92_v14   ;;  %v660_v54 = vld [vmem:[%s1364_s6] sm:$0xff]  ;;  %v661_v55 = vld [vmem:[%s1364_s6 + $0x8] sm:$0xff]  ;;  %v940_v60 = vld [vmem:[%s1359_s1 + $0x30] sm:$0xff]  ;;  %s801_s6 = sshll.u32 %s1369_s11, 4  ;;  %s802_s6 = int_to_ptr.hbm [resolvable:$true] %s801_s6 }
  0x19   :  { %v727_v56 = vld [vmem:[%s1366_s8] sm:$0xff] }
  0x1a   :  { %v751_v57 = vld [vmem:[%s1367_s9] sm:$0xff] }
  0x1b   :  { %v765_v59 = vld [vmem:[#allocation2] sm:$0x1] }
  0x1d   :  { %211 = vperm.xlu0 %966, %v93_v15   ;;  %126 = vperm.xlu1 %967, %v76_v16  }
  0x20   :  { %131 = vperm.xlu2 %968, %v77_v17  }
  0x25   :  { %196 = vperm.xlu0 %966, %v90_v18   ;;  %201 = vperm.xlu1 %967, %v91_v19  }
  0x26   :  { %311 = vmatmul.bf16.gmra.mxu0 %v935_v20  ;;  %351 = vmatmul.bf16.gmra.mxu3 %v943_v21 }
  0x28   :  { %116 = vperm.xlu2 %968, %v74_v22  }
  0x2d   :  { %186 = vperm.xlu1 %967, %v88_v24   ;;  %121 = vperm.xlu0 %966, %v75_v25  }
  0x30   :  { %191 = vperm.xlu2 %968, %v89_v26  }
  0x35   :  { %111 = vperm.xlu1 %967, %v73_v27   ;;  %106 = vperm.xlu0 %966, %v72_v28  }
  0x36   :  { %316 = vmatmul.bf16.gmra.mxu0 %v936_v29  ;;  %356 = vmatmul.bf16.gmra.mxu3 %v944_v30 }
  0x38   :  { %176 = vperm.xlu2 %968, %v86_v31  }
  0x3d   :  { %181 = vperm.xlu0 %966, %v87_v32   ;;  %96 = vperm.xlu1 %967, %v70_v33  }
  0x40   :  { %101 = vperm.xlu2 %968, %v71_v34  }
  0x45   :  { %479 = vperm.xlu0 %966, %v425_v35   ;;  %484 = vperm.xlu1 %967, %v426_v36  }
  0x46   :  { %321 = vmatmul.bf16.gmra.mxu0 %v937_v37  ;;  %361 = vmatmul.bf16.gmra.mxu3 %v945_v38 }
  0x48   :  { %469 = vperm.xlu2 %968, %v423_v39  }
  0x4d   :  { %474 = vperm.xlu0 %966, %v424_v40   ;;  %459 = vperm.xlu1 %967, %v421_v41  }
  0x50   :  { %464 = vperm.xlu2 %968, %v422_v42  }
  0x55   :  { %449 = vperm.xlu0 %966, %v419_v43   ;;  %454 = vperm.xlu1 %967, %v420_v44  }
  0x56   :  { %326 = vmatmul.bf16.gmra.mxu0 %v938_v45 }
  0x58   :  { %439 = vperm.xlu2 %968, %v417_v46  }
  0x5d   :  { %444 = vperm.xlu0 %966, %v418_v47   ;;  %429 = vperm.xlu1 %967, %v415_v48  }
  0x60   :  { %434 = vperm.xlu2 %968, %v416_v49  }
  0x62   :  { %v1217_v53 = vpop.permute.xlu2 %146 }
  0x65   :  { %676 = vperm.xlu0 %966, %v662_v50   ;;  %681 = vperm.xlu1 %967, %v663_v51  }
  0x66   :  { %331 = vmatmul.bf16.gmra.mxu0 %v939_v52 }
  0x68   :  { %666 = vperm.xlu2 %968, %v660_v54  }
  0x6a   :  { %v1231_v58 = vpop.permute.xlu2 %151 }
  0x6d   :  { %671 = vperm.xlu0 %966, %v661_v55   ;;  %730 = vperm.xlu1 %967, %v727_v56  }
  0x70   :  { %754 = vperm.xlu2 %968, %v751_v57  }
  0x72   :  { %v207_v63 = vpop.permute.xlu2 %206 }
  0x75   :  { %768 = vperm.xlu0 %966, %v765_v59  }
  0x76   :  { %336 = vmatmul.bf16.gmra.mxu0 %v940_v60 }
  0x77   :  { %v167_v61 = vpop.permute.xlu0 %166  ;;  %v1236_v62 = vpop.permute.xlu1 %156 }
  0x7a   :  { %v132_v2 = vpop.permute.xlu2 %131 }
  0x7f   :  { %v172_v0 = vpop.permute.xlu0 %171  ;;  %v1238_v1 = vpop.permute.xlu1 %161 }
  0x82   :  { %v117_v5 = vpop.permute.xlu2 %116 }
  0x87   :  { %v1240_v3 = vpop.permute.xlu1 %141  ;;  %v1242_v4 = vpop.permute.xlu0 %136 }
  0x8a   :  { %v192_v9 = vpop.permute.xlu2 %191 }
  0x8f   :  { %v212_v6 = vpop.permute.xlu0 %211  ;;  %v127_v7 = vpop.permute.xlu1 %126 }
  0x92   :  { %v1246_v16 = vpop.permute.xlu2 %176 }
  0x93   :  { %v307_v8 = vpop.f32.mrf.mxu0 }
  0x97   :  { %v197_v10 = vpop.permute.xlu0 %196  ;;  %v202_v11 = vpop.permute.xlu1 %201 }
  0x99   :  { %v1244_v12 = vpop.f32.mrf.mxu3 }
  0x9a   :  { %v102_v23 = vpop.permute.xlu2 %101  ;;  %v342_v29 = vpop.f32.mrf.mxu2 }
  0x9b   :  { %v309_v13 = vpop.f32.mrf.mxu0  ;;  %v343_v37 = vadd.f32 %v342_v29, %v167_v61 }
  0x9c   :  { %v310_v26 = vadd.f32 %v309_v13, %v102_v23 }
  0x9d   :  { %v381_v41 = vmax.f32 %v343_v37, 0.0  ;;  %v948_v37 = vld [vmem:[%s1361_s3 + $0x14] sm:$0xf] }
  0x9e   :  { %v368_v34 = vmax.f32 %v310_v26, 0.0 }
  0x9f   :  { %v187_v14 = vpop.permute.xlu1 %186  ;;  %v122_v15 = vpop.permute.xlu0 %121 }
  0xa1   :  { %v1248_v17 = vpop.f32.mrf.mxu3 }
  0xa2   :  { %v344_v39 = vpop.f32.mrf.mxu2 }
  0xa3   :  { %v312_v18 = vpop.f32.mrf.mxu0  ;;  %v345_v40 = vadd.f32 %v344_v39, %v172_v0  ;;  %v878_v39 = vld [vmem:[%s1361_s3 + $0x18] sm:$0xf0] }
  0xa5   :  { %v382_v43 = vmax.f32 %v345_v40, 0.0 }
  0xa7   :  { %v112_v19 = vpop.permute.xlu1 %111  ;;  %v107_v20 = vpop.permute.xlu0 %106  ;;  %v410_v47 = vpack.c.bf16 %v382_v43, %v381_v41  ;;  %v881_v43 = vor.u32 %v948_v37, %v878_v39 }
  0xa8   :  { %v313_v22 = vadd.f32 %v312_v18, %v107_v20 }
  0xa9   :  { %v352_v21 = vpop.f32.mrf.mxu3  ;;  %560 = vmatpush.bf16.msra.mxu1 %v410_v47 }
  0xaa   :  { %v369_v27 = vmax.f32 %v313_v22, 0.0 }
  0xab   :  { %v314_v24 = vpop.f32.mrf.mxu0 }
  0xac   :  { %v315_v25 = vadd.f32 %v314_v24, %v112_v19  ;;  %v353_v19 = vadd.f32 %v352_v21, %v187_v14 }
  0xae   :  { %v370_v28 = vmax.f32 %v315_v25, 0.0 }
  0xaf   :  { %v97_v30 = vpop.permute.xlu1 %96 }
  0xb0   :  { %v308_v31 = vadd.f32 %v307_v8, %v97_v30  ;;  %v1250_v32 = vpack.c.bf16 %v370_v28, %v369_v27  ;;  %v385_v27 = vmax.f32 %v353_v19, 0.0  ;;  %v182_v28 = vpop.permute.xlu0 %181  ;;  %v892_v19 = vld [vmem:[%s1361_s3 + $0x30] sm:$0xf] }
  0xb1   :  { %v354_v33 = vpop.f32.mrf.mxu3 }
  0xb2   :  { %v367_v35 = vmax.f32 %v308_v31, 0.0  ;;  %v355_v22 = vadd.f32 %v354_v33, %v192_v9  ;;  %v946_v31 = vld [vmem:[%s1361_s3 + $0x4] sm:$0xf] }
  0xb3   :  { %v317_v36 = vpop.f32.mrf.mxu0 }
  0xb4   :  { %v1252_v38 = vpack.c.bf16 %v368_v34, %v367_v35  ;;  %v318_v44 = vadd.f32 %v317_v36, %v117_v5 }
  0xb6   :  { %v371_v48 = vmax.f32 %v318_v44, 0.0 }
  0xb9   :  { %v357_v42 = vpop.f32.mrf.mxu3 }
  0xba   :  { %v358_v0 = vadd.f32 %v357_v42, %v197_v10  ;;  %v350_v10 = vadd.f32 %v1248_v17, %v182_v28  ;;  %v470_v28 = vpop.permute.xlu2 %469 }
  0xbb   :  { %v319_v45 = vpop.f32.mrf.mxu0 }
  0xbc   :  { %v320_v46 = vadd.f32 %v319_v45, %v122_v15  ;;  %v387_v23 = vmax.f32 %v358_v0, 0.0  ;;  %v384_v21 = vmax.f32 %v350_v10, 0.0  ;;  %v884_v0 = vld [vmem:[%s1361_s3 + $0x20] sm:$0xf] }
  0xbe   :  { %v372_v49 = vmax.f32 %v320_v46, 0.0 }
  0xc0   :  { %v1254_v50 = vpack.c.bf16 %v372_v49, %v371_v48 }
  0xc1   :  { %v359_v51 = vpop.f32.mrf.mxu3 }
  0xc2   :  { %v360_v8 = vadd.f32 %v359_v51, %v202_v11 }
  0xc3   :  { %v322_v52 = vpop.f32.mrf.mxu0 }
  0xc4   :  { %v323_v55 = vadd.f32 %v322_v52, %v127_v7  ;;  %v388_v24 = vmax.f32 %v360_v8, 0.0  ;;  %v386_v7 = vmax.f32 %v355_v22, 0.0  ;;  %v947_v52 = vld [vmem:[%s1361_s3 + $0x4] sm:$0xf0] }
  0xc5   :  { %v951_v8 = vld [vmem:[%s1361_s3 + $0x24] sm:$0xf0] }
  0xc6   :  { %v373_v59 = vmax.f32 %v323_v55, 0.0  ;;  %v952_v55 = vld [vmem:[%s1361_s3 + $0x34] sm:$0xf] }
  0xc9   :  { %v362_v54 = vpop.f32.mrf.mxu3 }
  0xca   :  { %v363_v60 = vadd.f32 %v362_v54, %v207_v63  ;;  %v348_v63 = vadd.f32 %v1244_v12, %v1246_v16  ;;  %v870_v12 = vld [vmem:[%s1361_s3 + $0x8] sm:$0xf0] }
  0xcb   :  { %v324_v56 = vpop.f32.mrf.mxu0  ;;  %v873_v16 = vor.u32 %v946_v31, %v870_v12 }
  0xcc   :  { %v325_v57 = vadd.f32 %v324_v56, %v132_v2  ;;  %v389_v15 = vmax.f32 %v363_v60, 0.0  ;;  %v413_v2 = vpack.c.bf16 %v388_v24, %v387_v23  ;;  %v383_v14 = vmax.f32 %v348_v63, 0.0  ;;  %v876_v56 = vld [vmem:[%s1361_s3 + $0x10] sm:$0xf]  ;;  %v902_v60 = vld [vmem:[%s1361_s3 + $0x48] sm:$0xf0] }
  0xcd   :  { %v900_v23 = vld [vmem:[%s1361_s3 + $0x40] sm:$0xf]  ;;  %v955_v24 = vld [vmem:[%s1361_s3 + $0x44] sm:$0xf0] }
  0xce   :  { %v374_v61 = vmax.f32 %v325_v57, 0.0  ;;  %v411_v9 = vpack.c.bf16 %v384_v21, %v383_v14  ;;  %v480_v21 = vpop.permute.xlu0 %479 }
  0xd0   :  { %v406_v5 = vpack.c.bf16 %v374_v61, %v373_v59  ;;  %v954_v59 = vld [vmem:[%s1361_s3 + $0x44] sm:$0xf] }
  0xd1   :  { %v364_v13 = vpop.f32.mrf.mxu3  ;;  %v905_v61 = vor.u32 %v954_v59, %v902_v60 }
  0xd2   :  { %v365_v18 = vadd.f32 %v364_v13, %v212_v6  ;;  %v412_v6 = vpack.c.bf16 %v386_v7, %v385_v27  ;;  %v956_v13 = vld [vmem:[%s1361_s3 + $0x54] sm:$0xf]  ;;  %v957_v27 = vld [vmem:[%s1361_s3 + $0x54] sm:$0xf0] }
  0xd3   :  { %v327_v20 = vpop.f32.mrf.mxu0 }
  0xd4   :  { %v390_v25 = vmax.f32 %v365_v18, 0.0 }
  0xd6   :  { %v414_v26 = vpack.c.bf16 %v390_v25, %v389_v15  ;;  %v910_v15 = vld [vmem:[%s1361_s3 + $0x58] sm:$0xf0]  ;;  %v901_v25 = vor.u32 %v955_v24, %v900_v23 }
  0xd7   :  { %v913_v18 = vor.u32 %v956_v13, %v910_v15 }
  0xd8   :  { %603 = vmatpush.bf16.msrb.mxu2 %v414_v26  ;;  %v908_v26 = vld [vmem:[%s1361_s3 + $0x50] sm:$0xf] }
  0xd9   :  { %v909_v7 = vor.u32 %v957_v27, %v908_v26 }
  0xdb   :  { %v329_v11 = vpop.f32.mrf.mxu0 }
  0xdc   :  { %604 = vmatpush.bf16.msrb.mxu2 %v413_v2  ;;  %v485_v2 = vpop.permute.xlu1 %484 }
  0xe0   :  { %605 = vmatpush.bf16.msrb.mxu2 %v412_v6 }
  0xe3   :  { %v332_v29 = vpop.f32.mrf.mxu0 }
  0xe4   :  { %606 = vmatpush.bf16.msrb.mxu2 %v411_v9  ;;  %v333_v40 = vadd.f32 %v332_v29, %v1217_v53  ;;  %v950_v53 = vld [vmem:[%s1361_s3 + $0x24] sm:$0xf]  ;;  %v460_v63 = vpop.permute.xlu1 %459 }
  0xe7   :  { %914 = vmatmul.msk.bf16.vlgmr.msrb.gmra.mxu2 %vm541_vm0, %v873_v16 }
  0xeb   :  { %v334_v30 = vpop.f32.mrf.mxu0 }
  0xec   :  { %v335_v35 = vadd.f32 %v334_v30, %v1231_v58  ;;  %v328_v58 = vadd.f32 %v327_v20, %v1242_v4  ;;  %v868_v4 = vld [vmem:[%s1361_s3] sm:$0xf]  ;;  %v953_v20 = vld [vmem:[%s1361_s3 + $0x34] sm:$0xf0]  ;;  %v455_v6 = vpop.permute.xlu1 %454 }
  0xed   :  { %v869_v54 = vor.u32 %v947_v52, %v868_v4  ;;  %v893_v22 = vor.u32 %v953_v20, %v892_v19 }
  0xee   :  { %v378_v44 = vmax.f32 %v335_v35, 0.0  ;;  %v375_v48 = vmax.f32 %v328_v58, 0.0 }
  0xf3   :  { %v337_v17 = vpop.f32.mrf.mxu0 }
  0xf4   :  { %v338_v33 = vadd.f32 %v337_v17, %v1236_v62  ;;  %v330_v62 = vadd.f32 %v329_v11, %v1240_v3  ;;  %v886_v3 = vld [vmem:[%s1361_s3 + $0x28] sm:$0xf0]  ;;  %v465_v11 = vpop.permute.xlu2 %464  ;;  %v430_v29 = vpop.permute.xlu1 %429 }
  0xf5   :  { %v889_v51 = vor.u32 %v950_v53, %v886_v3  ;;  %v475_v17 = vpop.permute.xlu0 %474 }
  0xf6   :  { %v379_v41 = vmax.f32 %v338_v33, 0.0  ;;  %v376_v46 = vmax.f32 %v330_v62, 0.0 }
  0xf7   :  { %915 = vmatmul.msk.bf16.gmra.mxu2 %vm541_vm0, %v881_v43 }
  0xf8   :  { %v407_v49 = vpack.c.bf16 %v376_v46, %v375_v48 }
  0xfb   :  { %v339_v34 = vpop.f32.mrf.mxu0 }
  0xfc   :  { %v340_v36 = vadd.f32 %v339_v34, %v1238_v1  ;;  %v377_v1 = vmax.f32 %v333_v40, 0.0  ;;  %v440_v9 = vpop.permute.xlu2 %439 }
  0xfe   :  { %v380_v42 = vmax.f32 %v340_v36, 0.0  ;;  %v408_v47 = vpack.c.bf16 %v378_v44, %v377_v1 }
 0x100   :  { %v409_v45 = vpack.c.bf16 %v380_v42, %v379_v41  ;;  %v450_v41 = vpop.permute.xlu0 %449 }
 0x102   :  { %561 = vmatpush.bf16.msra.mxu1 %v409_v45 }
 0x104   :  { %v435_v33 = vpop.permute.xlu2 %434 }
 0x106   :  { %562 = vmatpush.bf16.msra.mxu1 %v408_v47 }
 0x107   :  { %916 = vmatmul.msk.bf16.gmra.mxu2 %vm541_vm0, %v889_v51 }
 0x108   :  { %v445_v58 = vpop.permute.xlu0 %444 }
 0x10a   :  { %563 = vmatpush.bf16.msra.mxu1 %v407_v49 }
 0x10e   :  { %564 = vmatpush.bf16.msra.mxu1 %v406_v5  ;;  %v885_v5 = vor.u32 %v951_v8, %v884_v0 }
 0x112   :  { %565 = vmatpush.bf16.msra.mxu1 %v1254_v50 }
 0x116   :  { %566 = vmatpush.bf16.msra.mxu1 %v1250_v32  ;;  %v894_v32 = vld [vmem:[%s1361_s3 + $0x38] sm:$0xf0] }
 0x117   :  { %v897_v50 = vor.u32 %v952_v55, %v894_v32 }
 0x119   :  { %917 = vmatmul.msk.bf16.gmra.mxu2 %vm541_vm0, %v897_v50 }
 0x11a   :  { %567 = vmatpush.bf16.msra.mxu1 %v1252_v38  ;;  %v949_v38 = vld [vmem:[%s1361_s3 + $0x14] sm:$0xf0] }
 0x11b   :  { %v877_v57 = vor.u32 %v949_v38, %v876_v56 }
 0x11d   :  { %568 = vmatmul.bf16.vlgmr.msra.gmra.mxu1 %v869_v54 }
 0x129   :  { %918 = vmatmul.msk.bf16.gmra.mxu2 %vm541_vm0, %v905_v61 }
 0x12d   :  { %573 = vmatmul.bf16.gmra.mxu1 %v877_v57 }
 0x139   :  { %919 = vmatmul.msk.bf16.gmra.mxu2 %vm541_vm0, %v913_v18 }
 0x13d   :  { %578 = vmatmul.bf16.gmra.mxu1 %v885_v5 }
 0x14d   :  { %583 = vmatmul.bf16.gmra.mxu1 %v893_v22 }
 0x15d   :  { %588 = vmatmul.bf16.gmra.mxu1 %v901_v25 }
 0x16a   :  { %v608_v10 = vpop.f32.mrf.mxu2 }
 0x16d   :  { %593 = vmatmul.bf16.gmra.mxu1 %v909_v7 }
 0x172   :  { %v610_v14 = vpop.f32.mrf.mxu2 }
 0x17a   :  { %v613_v31 = vpop.f32.mrf.mxu2 }
 0x182   :  { %v615_v36 = vpop.f32.mrf.mxu2 }
 0x18a   :  { %v618_v45 = vpop.f32.mrf.mxu2 }
 0x192   :  { %v620_v53 = vpop.f32.mrf.mxu2 }
 0x19a   :  { %v569_v30 = vpop.f32.mrf.mxu1 }
 0x19b   :  { %v570_v12 = vadd.f32 %v569_v30, %v430_v29 }
 0x19c   :  { %v623_v55 = vpop.f32.mrf.mxu2 }
 0x19d   :  { %v609_v16 = vadd.f32 %v608_v10, %v570_v12 }
 0x19f   :  { %v638_v39 = vmax.f32 %v609_v16, 0.0 }
 0x1a2   :  { %v571_v34 = vpop.f32.mrf.mxu1 }
 0x1a3   :  { %v572_v35 = vadd.f32 %v571_v34, %v435_v33  ;;  %v959_v33 = vld [vmem:[%s1363_s5 + $0x8] sm:$0xff] }
 0x1a4   :  { %v625_v50 = vpop.f32.mrf.mxu2 }
 0x1a5   :  { %v611_v37 = vadd.f32 %v610_v14, %v572_v35 }
 0x1a7   :  { %v639_v40 = vmax.f32 %v611_v37, 0.0 }
 0x1a9   :  { %v654_v42 = vpack.c.bf16 %v639_v40, %v638_v39  ;;  %v682_v39 = vpop.permute.xlu1 %681 }
 0x1aa   :  { %v574_v43 = vpop.f32.mrf.mxu1 }
 0x1ab   :  { %v575_v62 = vadd.f32 %v574_v43, %v440_v9 }
 0x1ac   :  { %v628_v38 = vpop.f32.mrf.mxu2 }
 0x1ad   :  { %v614_v44 = vadd.f32 %v613_v31, %v575_v62 }
 0x1af   :  { %v640_v48 = vmax.f32 %v614_v44, 0.0 }
 0x1b2   :  { %v576_v1 = vpop.f32.mrf.mxu1 }
 0x1b3   :  { %v577_v46 = vadd.f32 %v576_v1, %v445_v58 }
 0x1b4   :  { %v630_v59 = vpop.f32.mrf.mxu2 }
 0x1b5   :  { %v616_v47 = vadd.f32 %v615_v36, %v577_v46  ;;  %v677_v36 = vpop.permute.xlu0 %676 }
 0x1b7   :  { %v641_v49 = vmax.f32 %v616_v47, 0.0 }
 0x1b9   :  { %v655_v3 = vpack.c.bf16 %v641_v49, %v640_v48 }
 0x1ba   :  { %v579_v51 = vpop.f32.mrf.mxu1 }
 0x1bb   :  { %v580_v4 = vadd.f32 %v579_v51, %v450_v41 }
 0x1bc   :  { %v633_v61 = vpop.f32.mrf.mxu2 }
 0x1bd   :  { %v619_v52 = vadd.f32 %v618_v45, %v580_v4  ;;  %v672_v41 = vpop.permute.xlu0 %671  ;;  %v667_v45 = vpop.permute.xlu2 %666 }
 0x1c2   :  { %v581_v54 = vpop.f32.mrf.mxu1 }
 0x1c3   :  { %v582_v10 = vadd.f32 %v581_v54, %v455_v6  ;;  %v958_v6 = vld [vmem:[%s1363_s5] sm:$0xff] }
 0x1c4   :  { %v635_v20 = vpop.f32.mrf.mxu2 }
 0x1c5   :  { %v755_v54 = vpop.permute.xlu2 %754 }
 0x1ca   :  { %v584_v32 = vpop.f32.mrf.mxu1 }
 0x1cb   :  { %v585_v25 = vadd.f32 %v584_v32, %v460_v63 }
 0x1cd   :  { %v624_v30 = vadd.f32 %v623_v55, %v585_v25 }
 0x1cf   :  { %v644_v16 = vmax.f32 %v624_v30, 0.0 }
 0x1d2   :  { %v586_v56 = vpop.f32.mrf.mxu1 }
 0x1d3   :  { %v587_v22 = vadd.f32 %v586_v56, %v465_v11 }
 0x1d5   :  { %v626_v14 = vadd.f32 %v625_v50, %v587_v22 }
 0x1d7   :  { %v645_v12 = vmax.f32 %v626_v14, 0.0 }
 0x1d9   :  { %v657_v11 = vpack.c.bf16 %v645_v12, %v644_v16 }
 0x1da   :  { %v589_v57 = vpop.f32.mrf.mxu1 }
 0x1db   :  { %v590_v15 = vadd.f32 %v589_v57, %v470_v28 }
 0x1dd   :  { %v629_v26 = vadd.f32 %v628_v38, %v590_v15 }
 0x1df   :  { %v646_v31 = vmax.f32 %v629_v26, 0.0 }
 0x1e2   :  { %v591_v60 = vpop.f32.mrf.mxu1 }
 0x1e3   :  { %v592_v5 = vadd.f32 %v591_v60, %v475_v17  ;;  %v642_v17 = vmax.f32 %v619_v52, 0.0  ;;  %v769_v60 = vpop.permute.xlu0 %768 }
 0x1e5   :  { %v631_v23 = vadd.f32 %v630_v59, %v592_v5 }
 0x1e7   :  { %v647_v9 = vmax.f32 %v631_v23, 0.0 }
 0x1e9   :  { %v658_v28 = vpack.c.bf16 %v647_v9, %v646_v31 }
 0x1ea   :  { %v594_v0 = vpop.f32.mrf.mxu1 }
 0x1eb   :  { %v595_v8 = vadd.f32 %v594_v0, %v480_v21  ;;  %v621_v21 = vadd.f32 %v620_v53, %v582_v10  ;;  %v724_v53 = vld [vmem:[%s1365_s7] sm:$0xf]  ;;  %v771_v0 = vperm.slane %v769_v60, 0  ;;  %s1000_s7 = smov [#allocation3]  }
 0x1ec   :  { %s799_s21 = sshll.u32 %s1000_s7, 4  ;;  %s800_s21 = int_to_ptr.vmem [resolvable:$true] %s799_s21 }
 0x1ed   :  { %v634_v18 = vadd.f32 %v633_v61, %v595_v8 }
 0x1ef   :  { %v648_v27 = vmax.f32 %v634_v18, 0.0 }
 0x1f2   :  { %v596_v13 = vpop.f32.mrf.mxu1 }
 0x1f3   :  { %v597_v19 = vadd.f32 %v596_v13, %v485_v2  ;;  %v643_v2 = vmax.f32 %v621_v21, 0.0 }
 0x1f5   :  { %v636_v24 = vadd.f32 %v635_v20, %v597_v19  ;;  %v656_v63 = vpack.c.bf16 %v643_v2, %v642_v17 }
 0x1f7   :  { %v649_v7 = vmax.f32 %v636_v24, 0.0 }
 0x1f9   :  { %v659_v29 = vpack.c.bf16 %v649_v7, %v648_v27 }
 0x1fb   :  { %703 = vmatpush.bf16.msrb.mxu3 %v659_v29 }
 0x1ff   :  { %704 = vmatpush.bf16.msrb.mxu3 %v658_v28 }
 0x203   :  { %705 = vmatpush.bf16.msrb.mxu3 %v657_v11 }
 0x207   :  { %706 = vmatpush.bf16.msrb.mxu3 %v656_v63 }
 0x20b   :  { %707 = vmatpush.bf16.msrb.mxu3 %v655_v3  ;;  %v731_v3 = vpop.permute.xlu1 %730 }
 0x20f   :  { %708 = vmatpush.bf16.msrb.mxu3 %v654_v42 }
 0x212   :  { %928 = vmatmul.msk.bf16.vlgmr.msrb.gmra.mxu3 %vm694_vm1, %v958_v6 }
 0x222   :  { %929 = vmatmul.msk.bf16.gmra.mxu3 %vm694_vm1, %v959_v33 }
 0x295   :  { %v710_v34 = vpop.f32.mrf.mxu3 }
 0x296   :  { %v711_v58 = vadd.f32 %v710_v34, %v667_v45 }
 0x298   :  { %v720_v48 = vmax.f32 %v711_v58, 0.0 }
 0x29d   :  { %v712_v35 = vpop.f32.mrf.mxu3 }
 0x29e   :  { %v713_v62 = vadd.f32 %v712_v35, %v672_v41 }
 0x2a0   :  { %v721_v46 = vmax.f32 %v713_v62, 0.0 }
 0x2a2   :  { %v725_v49 = vpack.c.bf16 %v721_v46, %v720_v48 }
 0x2a5   :  { %v715_v37 = vpop.f32.mrf.mxu3 }
 0x2a6   :  { %v716_v40 = vadd.f32 %v715_v37, %v677_v36 }
 0x2a8   :  { %v722_v42 = vmax.f32 %v716_v40, 0.0 }
 0x2ad   :  { %v717_v43 = vpop.f32.mrf.mxu3 }
 0x2ae   :  { %v718_v44 = vadd.f32 %v717_v43, %v682_v39 }
 0x2b0   :  { %v723_v1 = vmax.f32 %v718_v44, 0.0 }
 0x2b2   :  { %v726_v47 = vpack.c.bf16 %v723_v1, %v722_v42 }
 0x2b4   :  { %743 = vmatpush.bf16.msra.mxu3 %v726_v47 }
 0x2b8   :  { %744 = vmatpush.bf16.msra.mxu3 %v725_v49 }
 0x2bb   :  { %930 = vmatmul.msk.bf16.vlgmr.msra.gmra.mxu3 %vm733_vm2, %v724_v53 }
 0x33e   :  { %v746_v51 = vpop.f32.mrf.mxu3 }
 0x33f   :  { %v747_v4 = vadd.f32 %v746_v51, %v731_v3 }
 0x341   :  { %v750_v52 = vmax.f32 %v747_v4, 0.0 }
 0x343   :  { %v757_v55 = vmul.f32 %v755_v54, %v750_v52 }
 0x345   :  { %v758_v32 = vsel %vm733_vm2, %v757_v55, 0.0 }
 0x346   :  { %v759_v50 = vrot.slane %v758_v32, 4  ;;  %v748_v56 = vpop.f32.mrf.mxu3 }
 0x348   :  { %v760_v38 = vadd.f32 %v759_v50, %v758_v32 }
 0x34a   :  { %v761_v57 = vrot.slane %v760_v38, 2 }
 0x34c   :  { %v762_v59 = vadd.f32 %v761_v57, %v760_v38 }
 0x34e   :  { %v763_v61 = vrot.slane %v762_v59, 1 }
 0x350   :  { %v764_v8 = vadd.f32 %v763_v61, %v762_v59 }
 0x352   :  { %v772_v5 = vadd.f32 %v771_v0, %v764_v8 }
 0x354   :  { %v931_v13 = vmul.f32 -1.442695, %v772_v5 }
 0x356   :  { %969 = vpow2.f32 %v931_v13 }
 0x35c   :  { %v970_v15 = vpop.eup %969 }
 0x35d   :  { %v776_v18 = vadd.f32 1.0, %v970_v15 }
 0x35f   :  { %971 = vrcp.f32 %v776_v18  ;;  %v788_v23 = vand.u32 2147483648, %v776_v18  ;;  %v786_v25 = vand.u32 2147483647, %v776_v18  ;;  %vm782_vm4 = vweird.f32 %v776_v18 }
 0x361   :  { %v789_v27 = vor.u32 1.1754944e-38, %v788_v23  ;;  %vm787_vm7 = vcmp.eq.f32.partialorder %v786_v25, 8.507059e+37 }
 0x365   :  { %v972_v19 = vpop.eup %971 }
 0x366   :  { %v778_v20 = vmul.f32 %v972_v19, %v776_v18  ;;  %vm783_vm3 = vweird.f32 %v972_v19 }
 0x367   :  { %vm784_vm5 = vmor %vm782_vm4, %vm783_vm3 }
 0x368   :  { %v779_v22 = vsub.f32 1.0, %v778_v20 }
 0x36a   :  { %v780_v24 = vmul.f32 %v972_v19, %v779_v22 }
 0x36c   :  { %v781_v26 = vadd.f32 %v972_v19, %v780_v24 }
 0x36e   :  { %v785_v7 = vsel %vm784_vm5, %v972_v19, %v781_v26 }
 0x36f   :  { %v790_v10 = vsel %vm787_vm7, %v789_v27, %v785_v7 }
 0x370   :  { %793 = vst.msk [vmem:[#allocation3] sm:$0x1] %vm792_vm6, %v790_v10 }
 0x371   :  { %804 = dma.vmem_to_hbm [thread:$0]  %s800_s21, 16, %s802_s6, [#allocation4]  }
 0x372   :  { %997 = dma.done.wait [#allocation4], 16  }
 0x373   :  { %998 = vsyncadd [#allocation4], 4294967280 }
 0x374   :  { %809 = vsyncpa [#allocation4], 1 }

</bundles_post_ra>
